<compile_context>
chip_gen: v7x
topology: tpu7x:2x2x1
jax: 0.10.0
libtpu: 0.0.40
codegen_flags: <defaults>
</compile_context>

<pallas_src>
import jax
import jax.numpy as jnp
from jax.experimental import pallas as pl
from jax.experimental.pallas import tpu as pltpu


def _round_up(n: int, m: int) -> int:
    return (n + m - 1) // m * m


def _cdiv(a: int, b: int) -> int:
    return (a + b - 1) // b


def _make_kernel(hoist_weight: bool, tk: int):
    """Build the kernel body.

    hoist_weight=True  -> w_ref is the full (1, Dp) row (constant block index,
                          DMA'd once); slice the current k-chunk in-kernel.
    hoist_weight=False -> w_ref is the (1, tk) slice for this k step.
    """

    def kernel(x_ref, w_ref, o_ref, acc_ref):
        k = pl.program_id(1)

        @pl.when(k == 0)
        def _init():
            acc_ref[...] = jnp.zeros_like(acc_ref)

        if hoist_weight:
            off = pl.multiple_of(k * tk, tk)          # tk is a multiple of 128 here
            w_tile = w_ref[:, pl.ds(off, tk)]
        else:
            w_tile = w_ref[...]

        # (tb, tk) . (1, tk)^T -> (tb, 1) on the MXU, accumulated in f32.
        acc_ref[...] += jax.lax.dot_general(
            x_ref[...],
            w_tile,
            dimension_numbers=(((1,), (1,)), ((), ())),
            preferred_element_type=jnp.float32,
        )

        @pl.when(k == pl.num_programs(1) - 1)
        def _finalize():
            o_ref[...] = jax.nn.sigmoid(acc_ref[...]).astype(o_ref.dtype)

    return kernel


def logistic_regression(
    x: jax.Array,
    w: jax.Array,
    *,
    block_b: int = 2048,
    block_d: int = 2048,
    hoist_weight: bool | None = None,
) -> jax.Array:
    """y = sigmoid(x @ w^T) for x: (B, D) and w: (1, D) / (D,) / (D, 1). Returns (B, 1).

    block_b: batch rows per tile (aligned to the dtype's sublane packing).
    block_d: feature columns per tile (multiple of 128 when D is tiled).
    hoist_weight: None = auto (hoist the full weight row when it comfortably
        fits VMEM); True/False to force.  Pass bf16 x/w to halve HBM read
        traffic — the kernel does NOT cast for you (a wrapper-side cast would
        add a full extra HBM round trip).
    """
    B, D = x.shape
    w_row = jnp.asarray(w).reshape(1, -1)
    assert w_row.shape[1] == D, f"weight has {w_row.shape[1]} features, expected {D}"
    if w_row.dtype != x.dtype:
        w_row = w_row.astype(x.dtype)  # weight is tiny; keep a single MXU input dtype
    out_dtype = x.dtype

    itemsize = x.dtype.itemsize
    # Sublane packing: 2-byte dtypes pack 2 rows/sublane, 1-byte dtypes 4.
    row_align = 8 if itemsize >= 4 else (16 if itemsize == 2 else 32)

    # --- batch tile ---------------------------------------------------------
    B_aligned = _round_up(B, row_align)
    tb = min(_round_up(max(block_b, row_align), row_align), B_aligned)
    if B_aligned > row_align:
        # Guarantee >=2 batch blocks when possible so both v7x TensorCores
        # (grid axis 0 is "parallel") get work even for B <= block_b.
        tb = min(tb, _round_up(_cdiv(B_aligned, 2), row_align))

    # --- feature tile -------------------------------------------------------
    if D <= block_d:
        tk = D  # single feature block == full dim (no 128-multiple requirement)
    else:
        tk = _round_up(max(block_d, 128), 128)

    Bp = _round_up(B, tb)
    Dp = _round_up(D, tk)
    if (Bp, Dp) != (B, D):
        x = jnp.pad(x, ((0, Bp - B), (0, Dp - D)))
        w_row = jnp.pad(w_row, ((0, 0), (0, Dp - D)))

    nb, nk = Bp // tb, Dp // tk

    # --- weight spec: hoist the full row when it's cheap --------------------
    w_itemsize = w_row.dtype.itemsize
    if hoist_weight is None:
        # (1, Dp) pads to 8 sublanes in VMEM -> footprint ~ 8*Dp*itemsize.
        hoist_weight = (8 * Dp * w_itemsize) <= 4 * 1024 * 1024
    if nk == 1:
        # Single k block: the per-k index map is already constant; avoid a
        # dynamic slice on a possibly non-128-multiple lane dim.
        hoist_weight = False
    w_block = (1, Dp) if hoist_weight else (1, tk)
    w_index_map = (lambda i, k: (0, 0)) if hoist_weight else (lambda i, k: (0, k))

    # --- VMEM budget derived from the actual tiles --------------------------
    x_vmem = 2 * tb * tk * itemsize                                  # double-buffered x
    w_vmem = 2 * 8 * (Dp if hoist_weight else tk) * w_itemsize       # 8-sublane padded
    o_vmem = 2 * tb * 128 * jnp.dtype(out_dtype).itemsize            # 128-lane padded
    acc_vmem = tb * 128 * 4
    vmem_limit = x_vmem + w_vmem + o_vmem + acc_vmem + (4 << 20)     # + headroom
    vmem_limit = int(min(max(vmem_limit, 32 << 20), 128 << 20))
    # TODO(synk): on v6e (128 MiB VMEM) larger block_d (e.g. 4096) and on v7x
    # pipeline_mode=pl.Buffered(3) on the x BlockSpec are worth a sweep.

    cost = pl.CostEstimate(
        flops=2 * Bp * Dp,
        transcendentals=Bp,
        bytes_accessed=Bp * Dp * itemsize
        + Dp * w_itemsize
        + Bp * jnp.dtype(out_dtype).itemsize,
    )

    out = pl.pallas_call(
        _make_kernel(hoist_weight, tk),
        out_shape=jax.ShapeDtypeStruct((Bp, 1), out_dtype),
        grid_spec=pltpu.PrefetchScalarGridSpec(
            num_scalar_prefetch=0,
            grid=(nb, nk),
            in_specs=[
                pl.BlockSpec((tb, tk), lambda i, k: (i, k)),  # x tile (streams HBM)
                pl.BlockSpec(w_block, w_index_map),           # weight row / slice
            ],
            out_specs=pl.BlockSpec((tb, 1), lambda i, k: (i, 0)),
            scratch_shapes=[pltpu.VMEM((tb, 1), jnp.float32)],
        ),
        compiler_params=pltpu.CompilerParams(
            dimension_semantics=("parallel", "arbitrary"),
            vmem_limit_bytes=vmem_limit,
        ),
        cost_estimate=cost,
    )(x, w_row)

    return out if Bp == B else out[:B]


def reference(x, w):
    return jax.nn.sigmoid(x.astype(jnp.float32) @ jnp.asarray(w).reshape(-1, 1).astype(jnp.float32))


if __name__ == "__main__":
    root = jax.random.PRNGKey(0)

    def make_inputs(batch, input_dim, salt, dtype=jnp.float32):
        kx, kw = jax.random.split(jax.random.fold_in(root, salt))
        x = jax.random.normal(kx, (batch, input_dim), dtype=jnp.float32)
        bound = 1.0 / (input_dim ** 0.5)  # mimic nn.Linear init; torch layout (1, D)
        w = jax.random.uniform(kw, (1, input_dim), jnp.float32, -bound, bound)
        return x.astype(dtype), w.astype(dtype)

    # 1) tiny case: full-D block, batch split into 2 blocks for megacore.
    x, w = make_inputs(16, 32, 0)
    out = jax.block_until_ready(logistic_regression(x, w))
    assert out.shape == (16, 1)
    assert jnp.allclose(out, reference(x, w), atol=1e-4, rtol=1e-4), "case 1 mismatch"

    # 2) tiled case: grid (2, 3) with the hoisted (constant-index) weight row.
    x, w = make_inputs(256, 384, 1)
    out = jax.block_until_ready(logistic_regression(x, w, block_b=256, block_d=128))
    assert out.shape == (256, 1)
    assert jnp.allclose(out, reference(x, w), atol=1e-4, rtol=1e-4), "case 2 mismatch"

    # 3) ragged shapes -> zero-padding on both axes; force the per-k weight path.
    x, w = make_inputs(100, 200, 2)
    out = jax.block_until_ready(
        logistic_regression(x, w, block_b=64, block_d=128, hoist_weight=False)
    )
    assert out.shape == (100, 1)
    assert jnp.allclose(out, reference(x, w), atol=1e-4, rtol=1e-4), "case 3 mismatch"

    # 4) genuinely-bf16 inputs (halves HBM read traffic); f32 accumulate/sigmoid.
    x, w = make_inputs(256, 384, 3, dtype=jnp.bfloat16)
    out = jax.block_until_ready(logistic_regression(x, w, block_b=128, block_d=128))
    assert out.shape == (256, 1)
    assert jnp.allclose(out.astype(jnp.float32), reference(x, w), atol=3e-2, rtol=3e-2), \
        "case 4 mismatch"

    print("KERNEL_OK")
</pallas_src>

<mosaic_0001>
module attributes {stable_mosaic.version = 11 : i64} {
  func.func @kernel(%arg0: i32, %arg1: i32, %arg2: memref<8x32xf32, #tpu.memory_space<vmem>>, %arg3: memref<1x32xf32, #tpu.memory_space<vmem>>, %arg4: memref<8x1xf32, #tpu.memory_space<vmem>>, %arg5: memref<8x1xf32, #tpu.memory_space<vmem>>) attributes {dimension_semantics = [#tpu.dimension_semantics<parallel>, #tpu.dimension_semantics<arbitrary>], iteration_bounds = array<i64: 2, 1>, scalar_prefetch = 0 : i64, scratch_operands = 1 : i64, tpu.core_type = #tpu.core_type<tc>, window_params = [{transform_indices = @transform_0, window_bounds = array<i64: 8, 32>}, {transform_indices = @transform_1, window_bounds = array<i64: 1, 32>}, {transform_indices = @transform_2, window_bounds = array<i64: 8, 1>}]} {
    %c0_i32 = arith.constant 0 : i32
    %0 = arith.cmpi eq, %arg1, %c0_i32 : i32
    %1 = arith.extui %0 : i1 to i32
    %c0_i32_0 = arith.constant 0 : i32
    %2 = arith.cmpi ne, %1, %c0_i32_0 : i32
    scf.if %2 {
      %cst_10 = arith.constant 0.000000e+00 : f32
      %12 = vector.broadcast %cst_10 : f32 to vector<8x1xf32>
      %c0_11 = arith.constant 0 : index
      %c0_12 = arith.constant 0 : index
      %13 = vector.load %arg5[%c0_11, %c0_12] : memref<8x1xf32, #tpu.memory_space<vmem>>, vector<8x1xf32>
      tpu.vector_store %arg5[%c0_11, %c0_12], %12 {strides = array<i32>} : memref<8x1xf32, #tpu.memory_space<vmem>>, vector<8x1xf32>,
    } else {
    }
    %c0 = arith.constant 0 : index
    %c0_1 = arith.constant 0 : index
    %3 = vector.load %arg3[%c0, %c0_1] : memref<1x32xf32, #tpu.memory_space<vmem>>, vector<1x32xf32>
    %c0_2 = arith.constant 0 : index
    %c0_3 = arith.constant 0 : index
    %4 = vector.load %arg5[%c0_2, %c0_3] : memref<8x1xf32, #tpu.memory_space<vmem>>, vector<8x1xf32>
    %c0_4 = arith.constant 0 : index
    %c0_5 = arith.constant 0 : index
    %5 = vector.load %arg2[%c0_4, %c0_5] : memref<8x32xf32, #tpu.memory_space<vmem>>, vector<8x32xf32>
    %cst = arith.constant dense<0.000000e+00> : vector<8x1xf32>
    %6 = tpu.matmul %5, %3, %cst {dimension_numbers = #tpu.dot_dimension_numbers<[1], [1], [0], [0], [0, 0, 1, 0], [], []>} : vector<8x32xf32>, vector<1x32xf32>, vector<8x1xf32> -> vector<8x1xf32>
    %7 = arith.addf %4, %6 : vector<8x1xf32>
    %c0_6 = arith.constant 0 : index
    %c0_7 = arith.constant 0 : index
    %8 = vector.load %arg5[%c0_6, %c0_7] : memref<8x1xf32, #tpu.memory_space<vmem>>, vector<8x1xf32>
    tpu.vector_store %arg5[%c0_6, %c0_7], %7 {strides = array<i32>} : memref<8x1xf32, #tpu.memory_space<vmem>>, vector<8x1xf32>,
    %c0_i32_8 = arith.constant 0 : i32
    %9 = arith.cmpi eq, %arg1, %c0_i32_8 : i32
    %10 = arith.extui %9 : i1 to i32
    %c0_i32_9 = arith.constant 0 : i32
    %11 = arith.cmpi ne, %10, %c0_i32_9 : i32
    scf.if %11 {
      %c0_10 = arith.constant 0 : index
      %c0_11 = arith.constant 0 : index
      %12 = vector.load %arg5[%c0_10, %c0_11] : memref<8x1xf32, #tpu.memory_space<vmem>>, vector<8x1xf32>
      %13 = arith.negf %12 : vector<8x1xf32>
      %14 = math.exp %13 : vector<8x1xf32>
      %cst_12 = arith.constant 1.000000e+00 : f32
      %15 = vector.broadcast %cst_12 : f32 to vector<8x1xf32>
      %16 = arith.addf %15, %14 : vector<8x1xf32>
      %17 = arith.divf %15, %16 : vector<8x1xf32>
      %c0_13 = arith.constant 0 : index
      %c0_14 = arith.constant 0 : index
      %18 = vector.load %arg4[%c0_13, %c0_14] : memref<8x1xf32, #tpu.memory_space<vmem>>, vector<8x1xf32>
      tpu.vector_store %arg4[%c0_13, %c0_14], %17 {strides = array<i32>} : memref<8x1xf32, #tpu.memory_space<vmem>>, vector<8x1xf32>,
    } else {
    }
    return
  }
  func.func @transform_0(%arg0: i32, %arg1: i32) -> (i32, i32) {
    %c0_i32 = arith.constant 0 : i32
    return %arg0, %arg1 : i32, i32
  }
  func.func @transform_1(%arg0: i32, %arg1: i32) -> (i32, i32) {
    %c0_i32 = arith.constant 0 : i32
    %c0_i32_0 = arith.constant 0 : i32
    return %c0_i32, %arg1 : i32, i32
  }
  func.func @transform_2(%arg0: i32, %arg1: i32) -> (i32, i32) {
    %c0_i32 = arith.constant 0 : i32
    %c0_i32_0 = arith.constant 0 : i32
    return %arg0, %c0_i32 : i32, i32
  }
}

</mosaic_0001>

<bundles_post_ra>
// kernel: tpu_custom_call.1
= control target key start
LH: loop header
LB: loop body
LE: loop exit
PB: predicated region body
PF: predicated region fallthrough
CT: control target
= control target key end

     0   :  { %7 = vsyncpa [#allocation4], 0  ;;  %s612_s0 = inlined_call_operand.hbm [shape: f32[16,32], index: 0, kind: input, shape index: {}]   ;;  %s613_s1 = inlined_call_operand.vmem [shape: f32[1,32], index: 1, kind: input, shape index: {}]   ;;  %s614_s2 = inlined_call_operand.vmem [shape: f32[16,1], index: 2, kind: output, shape index: {}]  }
   0x1   :  { %9 = vsyncpa [#allocation4 + $0x1], 0  ;;  %s481_s9 = smov 0   ;;  %s483_s10 = smov 0  }
   0x2   :  { %s485_s11 = smov 0   ;;  %s487_s12 = smov 0  }
   0x3   :  { %s489_s13 = smov 0   ;;  %s491_s14 = smov 0  }
   0x4 LB: > { %s308_s15 = sadd.s32 4294967295, %s462_s14   ;;  %s27_s16 = sadd.s32 1, %s458_s13  ;;  %s462_s14 = sphi %s491_s14, %s15_s14   ;;  %s458_s13 = sphi %s489_s13, %s624_s13   ;;  %s454_s12 = sphi %s487_s12, %s623_s12   ;;  %s450_s11 = sphi %s485_s11, %s622_s11   ;;  %s446_s10 = sphi %s483_s10, %s621_s10   ;;  %s442_s9 = sphi %s481_s9, %s620_s9  }
   0x5   : > { %p29_p0 = scmp.ge.s32.totalorder %s27_s16, 2  ;;  %s36_s17 = sadd.s32 1, %s450_s11 }
   0x6   : > { %p43_p1 = scmp.ne.s32.totalorder %s450_s11, %s446_s10  ;;  %p44_p2 = scmp.eq.s32.totalorder %s462_s14, 0 }
   0x7   : > { %s626_s16 = smov (%p29_p0, %s27_s16), 0  ;;  %p49_p4 = scmp.ne.s32.totalorder %s446_s10, %s442_s9 }
   0x8   : > { %p517_p3 = por %p44_p2, %p43_p1  ;;  %s31_s19 = ssub.s32 %s458_s13, %s626_s16 }
   0x9   : > { %p50_p5 = scmp.eq.s32.totalorder %s308_s15, 0  ;;  %p34_p6 = scmp.eq.s32.totalorder %s31_s19, 0 }
   0xa   : > { %p328_p8 = scmp.lt.s32.totalorder %s462_s14, 2  ;;  %s131_s22 = sand.u32 1, %s450_s11  }
   0xb   : > { %p524_p7 = por %p50_p5, %p49_p4  ;;  %s314_s23 = sshll.u32 %s458_s13, 7 }
   0xc   : > { %s530_s21 = scalar_select %p34_p6, %s450_s11, %s36_s17  }
   0xd   : > { %s313_s24 = sshll.u32 %s131_s22, 3  ;;  %s537_s27 = scalar_lea.hbm %s612_s0, %s314_s23 }
   0xe   : > { %s135_s28 = scalar_lea.vmem [#allocation3], %s313_s24  ;;  %p541_p9 = pnand %p328_p8, %p517_p3 }
   0xf   : > { %s143_s29 = sshll.u32 %s135_s28, 4  ;;  %s132_s3 = scalar_lea.sflag [#allocation4], %s131_s22  ;;  %s545_s29 = int_to_ptr.vmem [resolvable:$true] %s143_s29 }
  0x10   : > { %s382_s4 = scalar_lea.hbm %s537_s27, 128  ;;  %p384_p13 = pneg %p541_p9 }
  0x11   : > { %p383_p12 = scmp.ne.s32.totalorder %s537_s27, %s382_s4  ;;  %s387_s7 = scalar_lea.hbm %s612_s0, 256 }
  0x12   : > { %p388_p2 = scmp.lt.u32.totalorder %s537_s27, %s612_s0  ;;  %p389_p3 = scmp.lt.u32.totalorder %s387_s7, %s382_s4 }
  0x13   : > { %p385_p0 = pnand %p384_p13, %p383_p12  ;;  %p391_p5 = scmp.lt.u32.totalorder %s382_s4, %s537_s27 }
  0x14   : > { %p390_p4 = por %p389_p3, %p388_p2 }
  0x15   : > { %p386_p1 = pneg %p385_p0 }
  0x16   : > { %p392_p6 = por %p391_p5, %p390_p4 }
  0x18   : > { %p393_p8 = pnand %p392_p6, %p386_p1 }
  0x1a   : > { %396 = shalt.err (!%p393_p8)
}
  0x1b   : > { %s397_s15 = scalar_lea.vmem %s545_s29, 128  ;;  %s464_s17 = smov [#allocation3]  }
  0x1c   : > { %p398_p12 = scmp.ne.s32.totalorder %s545_s29, %s397_s15  ;;  %s402_s18 = sshll.u32 %s464_s17, 4  ;;  %s403_s18 = int_to_ptr.vmem [resolvable:$false] %s402_s18 }
  0x1d   : > { %s404_s19 = scalar_lea.vmem %s403_s18, 256  ;;  %p405_p11 = scmp.lt.s32.totalorder %s545_s29, %s403_s18 }
  0x1e   : > { %p400_p0 = pnand %p398_p12, %p384_p13  ;;  %p406_p2 = scmp.lt.s32.totalorder %s404_s19, %s397_s15 }
  0x20   : > { %p401_p10 = pneg %p400_p0  ;;  %p407_p3 = por %p406_p2, %p405_p11 }
  0x22   : > { %p408_p4 = pnand %p407_p3, %p401_p10 }
  0x24   : > { %411 = shalt.err (!%p408_p4)
}
  0x25   : > { %327 = dma.hbm_to_vmem [thread:$0]  (!%p541_p9), %s537_s27, 128, %s545_s29, %s132_s3  }
  0x26   : > { %p618_p1 = scmp.lt.s32.totalorder %s462_s14, 3  ;;  %p619_p5 = scmp.ge.s32.totalorder %s462_s14, 1 }
  0x28   : > { %p149_p13 = pnand %p619_p5, %p618_p1 }
  0x29   : > { %s154_s22 = sand.u32 (!%p149_p13), 1, %s446_s10  }
  0x2a   : > { %152 = sbr.rel (%p149_p13) target bundleno = 233 (0xe9), region = 28  ;;  %s316_s23 = sshll.u32 (!%p149_p13), %s154_s22, 3 }
  0x2b   : > { %s155_s24 = scalar_lea.sflag (!%p149_p13), [#allocation4], %s154_s22  ;;  %s158_s25 = scalar_lea.vmem (!%p149_p13), [#allocation3], %s316_s23 }
  0x31   : > { %437 = dma.done.wait (%p524_p7), %s155_s24, 128  }
  0x32   : > { %439 = vsyncadd (%p524_p7), %s155_s24, 4294967168  ;;  %vm192_vm0 = vcmask 7168   ;;  %v465_v0 = vmov 0.0   ;;  %v318_v1 = vld [vmem:[%s613_s1] ss:$0 sm:$0xff]  ;;  %v196_v2 = vld [vmem:[%s158_s25] sm:$0xff] }
  0x33   : > { %193 = vst.msk [vmem:[#allocation2] sm:$0xff] %vm192_vm0, %v465_v0  ;;  %vm204_vm1 = vcmask 261120   ;;  %v203_v3 = vmul.f32 %v318_v1, %v196_v2  ;;  %p184_p7 = scmp.lt.s32.totalorder %s454_s12, 1 }
  0x35   : > { %v205_v4 = vsel %vm204_vm1, %v203_v3, 0.0  ;;  %s628_s12 = smov (!%p184_p7, %s454_s12), 1 }
  0x36   : > { %206 = vadd.xlane.f32.xlu0 %v205_v4  ;;  %s317_s20 = sshll.u32 %s628_s12, 3 }
  0x37   : > { %s187_s30 = scalar_lea.vmem %s614_s2, %s317_s20 }
  0x3a   : > { %v195_v5 = vld [vmem:[#allocation2] sm:$0xff] }
  0xc3   : > { %v207_v6 = vpop.xlane.xlu0 %206 }
  0xc4   : > { %v208_v7 = vadd.f32 %v207_v6, %v195_v5 }
  0xc6   : > { %210 = vst.msk [vmem:[#allocation2] sm:$0xff] %vm192_vm0, %v208_v7 }
  0xcd   : > { %v214_v8 = vld [vmem:[#allocation2] sm:$0xff] }
  0xce   : > { %v319_v9 = vmul.f32 -1.442695, %v214_v8 }
  0xd0   : > { %378 = vpow2.f32 %v319_v9 }
  0xda   : > { %v379_v10 = vpop.eup %378 }
  0xdb   : > { %v218_v11 = vadd.f32 1.0, %v379_v10 }
  0xdd   : > { %380 = vrcp.f32 %v218_v11 }
  0xe7   : > { %v381_v12 = vpop.eup %380 }
  0xe8   : > { %221 = vst.msk [vmem:[%s187_s30] sm:$0xff] %vm192_vm0, %v381_v12 }
  0xe9 PF: > { %s15_s14 = sadd.s32 1, %s462_s14   ;;  %s620_s9 = smov %s446_s10 }
  0xea   : > { %p12_p9 = scmp.ge.s32.totalorder %s15_s14, 4   ;;  %s621_s10 = smov %s450_s11 }
  0xeb   : > { %s622_s11 = smov %s530_s21  ;;  %s623_s12 = smov %s458_s13 }
  0xec   : > { %s624_s13 = smov %s626_s16  ;;  %14 = sbr.rel (!%p12_p9) target bundleno = 4 (0x4), region = 79 }
  0xf3   :  { %241 = vsyncpa [#allocation4], 1 }
  0xf4   :  { %243 = vsyncpa [#allocation4 + $0x1], 1 }

</bundles_post_ra>
